<compile_context>
chip_gen: v7x
topology: tpu7x:2x2x1
jax: 0.10.0
libtpu: 0.0.40
codegen_flags: <defaults>
</compile_context>

<pallas_src>
import jax
import jax.numpy as jnp
from jax.experimental import pallas as pl
from jax.experimental.pallas import tpu as pltpu


_TARGET_TILE_BYTES = 4 * 1024 * 1024  # f32 logits tile; x2 for double buffering


def _round_up(x: int, m: int) -> int:
    return -(-x // m) * m


def _make_focal_loss_kernel(gamma: float, n_rows: int):
    g = float(gamma)

    def focal_weight(one_minus_p):
        # Integer gamma -> pure-VPU multiplies (exact, no exp/log, no NaN at 0).
        if g == 0.0:
            return jnp.ones_like(one_minus_p)
        if g.is_integer() and 0.0 < g <= 8.0:
            w = one_minus_p
            for _ in range(int(g) - 1):
                w = w * one_minus_p
            return w
        return jnp.power(one_minus_p, g)

    def kernel(x_ref, t_ref, a_ref, o_ref):
        i = pl.program_id(0)

        x = x_ref[...].astype(jnp.float32)        # (TN, C) logits tile
        t = t_ref[...]                            # (TN, 1) int32 target ids
        a = a_ref[...].astype(jnp.float32)        # (1, C)  per-class alpha

        tn, c = x.shape

        # softmax over the class axis: one reciprocal per row (EUP) instead of
        # TN*C divides on the VALU path.  Exact reciprocal keeps parity with
        # the PyTorch reference; approx=True would trade ~1e-3 rel. error.
        m = jnp.max(x, axis=1, keepdims=True)
        e = jnp.exp(x - m)
        s = jnp.sum(e, axis=1, keepdims=True)
        p = e * pl.reciprocal(s, approx=False)    # (TN, C)

        # one-hot class mask via iota compare (scatter_ equivalent), then
        # mask-sum gathers of the target probability and alpha.
        col = jax.lax.broadcasted_iota(jnp.int32, (tn, c), 1)
        onehot = (col == t).astype(jnp.float32)                 # (TN, C)
        probs = jnp.sum(p * onehot, axis=1, keepdims=True)      # (TN, 1)
        alpha = jnp.sum(a * onehot, axis=1, keepdims=True)      # (TN, 1)

        probs = jnp.clip(probs, 0.0001, 1.0)
        log_p = jnp.log(probs + 1e-8)
        loss = -alpha * focal_weight(1.0 - probs) * log_p       # (TN, 1)

        # zero out rows that only exist because of padding N up to the tile.
        row = i * tn + jax.lax.broadcasted_iota(jnp.int32, (tn, 1), 0)
        valid = (row < n_rows).astype(jnp.float32)

        partial = jnp.sum(loss * valid, axis=0, keepdims=True)  # (1, 1)
        # One aligned, unmasked (8,128) store per tile; final tiny reduction
        # happens in the wrapper, which keeps the grid axis fully parallel.
        o_ref[...] = jnp.broadcast_to(partial, o_ref.shape).astype(jnp.float32)

    return kernel


def focal_loss(inputs, targets, alpha=None, gamma=2.0, average=True,
               tile_rows=None):
    """Pallas TPU focal loss (forward), matching the PyTorch module.

    inputs : (N, C) float logits (f32 or bf16; compute is f32)
    targets: (N,)   int class ids
    alpha  : (C,) / (C, 1) per-class weights (default: ones, like the module)
    """
    N, C = inputs.shape
    if alpha is None:
        alpha = jnp.ones((C,), dtype=jnp.float32)
    alpha = jnp.asarray(alpha, dtype=jnp.float32).reshape(1, C)
    targets2d = jnp.asarray(targets, dtype=jnp.int32).reshape(N, 1)

    # Row-tile size: keep the double-buffered f32 logits tile around 8 MiB so
    # it fits scoped VMEM on v5e/v6e and leaves headroom on v7x (64 MiB phys).
    if tile_rows is None:
        tn = (_TARGET_TILE_BYTES // max(1, C * 4)) // 8 * 8
        tn = max(8, min(1024, tn))
    else:
        tn = max(8, _round_up(int(tile_rows), 8))
    tn = min(tn, _round_up(N, 8))      # don't over-pad tiny batches
    n_pad = _round_up(N, tn)
    num_tiles = n_pad // tn

    if n_pad != N:
        inputs = jnp.pad(inputs, ((0, n_pad - N), (0, 0)))
        targets2d = jnp.pad(targets2d, ((0, n_pad - N), (0, 0)))

    kernel = _make_focal_loss_kernel(float(gamma), N)

    partials = pl.pallas_call(
        kernel,
        out_shape=jax.ShapeDtypeStruct((num_tiles * 8, 128), jnp.float32),
        grid=(num_tiles,),
        in_specs=[
            pl.BlockSpec((tn, C), lambda i: (i, 0)),   # logits: streamed rows
            pl.BlockSpec((tn, 1), lambda i: (i, 0)),   # targets: streamed rows
            pl.BlockSpec((1, C), lambda i: (0, 0)),    # alpha: resident constant
        ],
        out_specs=pl.BlockSpec((8, 128), lambda i: (i, 0)),
        compiler_params=pltpu.CompilerParams(
            # Row tiles are independent -> lets v7x shard the loop across its
            # two TensorCores; harmless (serial loop) on v5e/v6e.
            dimension_semantics=("parallel",),
        ),
    )(inputs, targets2d, alpha)

    total = jnp.sum(partials[0::8, 0])                 # one scalar per tile
    if average:
        total = total / jnp.float32(N)
    return total


def focal_loss_ref(inputs, targets, alpha=None, gamma=2.0, average=True):
    """Pure-JAX reference mirroring the PyTorch forward exactly."""
    N, C = inputs.shape
    if alpha is None:
        alpha = jnp.ones((C,), dtype=jnp.float32)
    alpha = jnp.asarray(alpha, dtype=jnp.float32).reshape(C)
    P = jax.nn.softmax(inputs.astype(jnp.float32), axis=1)
    mask = jax.nn.one_hot(targets, C, dtype=jnp.float32)
    probs = jnp.sum(P * mask, axis=1, keepdims=True)
    a = alpha[targets].reshape(-1, 1)
    probs = jnp.clip(probs, 0.0001, 1.0)
    log_p = jnp.log(probs + 1e-8)
    batch_loss = -a * jnp.power(1.0 - probs, gamma) * log_p
    return jnp.mean(batch_loss) if average else jnp.sum(batch_loss)


if __name__ == "__main__":
    key = jax.random.PRNGKey(0)
    k1, k2, k3, k4 = jax.random.split(key, 4)

    # Main check: small shapes consistent with the module (class_num = 16).
    N, C = 8, 16
    inputs = jax.random.normal(k1, (N, C), dtype=jnp.float32)
    targets = jax.random.randint(k2, (N,), 0, C, dtype=jnp.int32)

    loss = jax.block_until_ready(focal_loss(inputs, targets, gamma=2.0, average=True))
    ref = jax.block_until_ready(focal_loss_ref(inputs, targets, gamma=2.0, average=True))
    assert jnp.allclose(loss, ref, rtol=1e-5, atol=1e-6), (loss, ref)

    # Second check: multi-tile grid, row padding (20 -> 24), non-trivial alpha,
    # and sum (average=False) reduction.
    N2, C2 = 20, 16
    inputs2 = jax.random.normal(k3, (N2, C2), dtype=jnp.float32)
    targets2 = jax.random.randint(k4, (N2,), 0, C2, dtype=jnp.int32)
    alpha2 = 0.5 + jnp.arange(C2, dtype=jnp.float32) / C2
    loss2 = jax.block_until_ready(
        focal_loss(inputs2, targets2, alpha=alpha2, gamma=2.0, average=False, tile_rows=8))
    ref2 = jax.block_until_ready(
        focal_loss_ref(inputs2, targets2, alpha=alpha2, gamma=2.0, average=False))
    assert jnp.allclose(loss2, ref2, rtol=1e-5, atol=1e-6), (loss2, ref2)

    print("KERNEL_OK")
</pallas_src>

<mosaic_0001>
module attributes {stable_mosaic.version = 11 : i64} {
  func.func @kernel(%arg0: i32, %arg1: memref<8x16xf32, #tpu.memory_space<vmem>>, %arg2: memref<8x1xi32, #tpu.memory_space<vmem>>, %arg3: memref<1x16xf32, #tpu.memory_space<vmem>>, %arg4: memref<8x128xf32, #tpu.memory_space<vmem>>) attributes {dimension_semantics = [#tpu.dimension_semantics<parallel>], iteration_bounds = array<i64: 1>, scalar_prefetch = 0 : i64, scratch_operands = 0 : i64, tpu.core_type = #tpu.core_type<tc>, window_params = [{transform_indices = @transform_0, window_bounds = array<i64: 8, 16>}, {transform_indices = @transform_1, window_bounds = array<i64: 8, 1>}, {pipeline_mode = #tpu.pipeline_mode<synchronous>, transform_indices = @transform_2, window_bounds = array<i64: 1, 16>}, {transform_indices = @transform_3, window_bounds = array<i64: 8, 128>}]} {
    %c0 = arith.constant 0 : index
    %c0_0 = arith.constant 0 : index
    %0 = vector.load %arg1[%c0, %c0_0] : memref<8x16xf32, #tpu.memory_space<vmem>>, vector<8x16xf32>
    %c0_1 = arith.constant 0 : index
    %c0_2 = arith.constant 0 : index
    %1 = vector.load %arg2[%c0_1, %c0_2] : memref<8x1xi32, #tpu.memory_space<vmem>>, vector<8x1xi32>
    %c0_3 = arith.constant 0 : index
    %c0_4 = arith.constant 0 : index
    %2 = vector.load %arg3[%c0_3, %c0_4] : memref<1x16xf32, #tpu.memory_space<vmem>>, vector<1x16xf32>
    %cst = arith.constant dense<0xFF800000> : vector<8xf32>
    %3 = vector.multi_reduction <maximumf>, %0, %cst [1] : vector<8x16xf32> to vector<8xf32>
    %4 = vector.shape_cast %3 : vector<8xf32> to vector<8x1xf32>
    %5 = vector.broadcast %4 : vector<8x1xf32> to vector<8x16xf32>
    %6 = arith.subf %0, %5 : vector<8x16xf32>
    %7 = math.exp %6 : vector<8x16xf32>
    %cst_5 = arith.constant dense<0.000000e+00> : vector<8xf32>
    %8 = vector.multi_reduction <add>, %7, %cst_5 [1] : vector<8x16xf32> to vector<8xf32>
    %9 = vector.shape_cast %8 : vector<8xf32> to vector<8x1xf32>
    %10 = tpu.reciprocal %9 : vector<8x1xf32> -> vector<8x1xf32>
    %11 = vector.broadcast %10 : vector<8x1xf32> to vector<8x16xf32>
    %12 = arith.mulf %7, %11 : vector<8x16xf32>
    %13 = tpu.iota {dimensions = array<i32: 1>} : vector<8x16xi32>
    %14 = vector.broadcast %1 : vector<8x1xi32> to vector<8x16xi32>
    %15 = arith.cmpi eq, %13, %14 : vector<8x16xi32>
    %16 = arith.extui %15 : vector<8x16xi1> to vector<8x16xi32>
    %17 = arith.sitofp %16 : vector<8x16xi32> to vector<8x16xf32>
    %18 = arith.mulf %12, %17 : vector<8x16xf32>
    %cst_6 = arith.constant dense<0.000000e+00> : vector<8xf32>
    %19 = vector.multi_reduction <add>, %18, %cst_6 [1] : vector<8x16xf32> to vector<8xf32>
    %20 = vector.shape_cast %19 : vector<8xf32> to vector<8x1xf32>
    %21 = vector.broadcast %2 : vector<1x16xf32> to vector<8x16xf32>
    %22 = arith.mulf %21, %17 : vector<8x16xf32>
    %cst_7 = arith.constant dense<0.000000e+00> : vector<8xf32>
    %23 = vector.multi_reduction <add>, %22, %cst_7 [1] : vector<8x16xf32> to vector<8xf32>
    %24 = vector.shape_cast %23 : vector<8xf32> to vector<8x1xf32>
    %cst_8 = arith.constant 9.99999974E-5 : f32
    %cst_9 = arith.constant 1.000000e+00 : f32
    %25 = vector.broadcast %cst_8 : f32 to vector<8x1xf32>
    %26 = arith.maximumf %25, %20 : vector<8x1xf32>
    %27 = vector.broadcast %cst_9 : f32 to vector<8x1xf32>
    %28 = arith.minimumf %27, %26 : vector<8x1xf32>
    %cst_10 = arith.constant 9.99999993E-9 : f32
    %29 = vector.broadcast %cst_10 : f32 to vector<8x1xf32>
    %30 = arith.addf %28, %29 : vector<8x1xf32>
    %31 = math.log %30 : vector<8x1xf32>
    %cst_11 = arith.constant 0.000000e+00 : f32
    %32 = vector.broadcast %cst_11 : f32 to vector<8x1xf32>
    %33 = arith.subf %32, %24 : vector<8x1xf32>
    %cst_12 = arith.constant 1.000000e+00 : f32
    %34 = vector.broadcast %cst_12 : f32 to vector<8x1xf32>
    %35 = arith.subf %34, %28 : vector<8x1xf32>
    %36 = arith.mulf %35, %35 : vector<8x1xf32>
    %37 = arith.mulf %33, %36 : vector<8x1xf32>
    %38 = arith.mulf %37, %31 : vector<8x1xf32>
    %c8_i32 = arith.constant 8 : i32
    %39 = arith.muli %arg0, %c8_i32 : i32
    %40 = tpu.iota {dimensions = array<i32: 0>} : vector<8x1xi32>
    %41 = vector.broadcast %39 : i32 to vector<8x1xi32>
    %42 = arith.addi %41, %40 : vector<8x1xi32>
    %c8_i32_13 = arith.constant 8 : i32
    %43 = vector.broadcast %c8_i32_13 : i32 to vector<8x1xi32>
    %44 = arith.cmpi slt, %42, %43 : vector<8x1xi32>
    %45 = arith.extui %44 : vector<8x1xi1> to vector<8x1xi32>
    %46 = arith.sitofp %45 : vector<8x1xi32> to vector<8x1xf32>
    %47 = arith.mulf %38, %46 : vector<8x1xf32>
    %cst_14 = arith.constant dense<0.000000e+00> : vector<1xf32>
    %48 = vector.multi_reduction <add>, %47, %cst_14 [0] : vector<8x1xf32> to vector<1xf32>
    %49 = vector.shape_cast %48 : vector<1xf32> to vector<1x1xf32>
    %50 = vector.shape_cast %49 : vector<1x1xf32> to vector<1x1xf32>
    %51 = vector.broadcast %50 : vector<1x1xf32> to vector<8x128xf32>
    %c0_15 = arith.constant 0 : index
    %c0_16 = arith.constant 0 : index
    %52 = vector.load %arg4[%c0_15, %c0_16] : memref<8x128xf32, #tpu.memory_space<vmem>>, vector<8x128xf32>
    tpu.vector_store %arg4[%c0_15, %c0_16], %51 {strides = array<i32>} : memref<8x128xf32, #tpu.memory_space<vmem>>, vector<8x128xf32>,
    return
  }
  func.func @transform_0(%arg0: i32) -> (i32, i32) {
    %c0_i32 = arith.constant 0 : i32
    %c0_i32_0 = arith.constant 0 : i32
    return %arg0, %c0_i32 : i32, i32
  }
  func.func @transform_1(%arg0: i32) -> (i32, i32) {
    %c0_i32 = arith.constant 0 : i32
    %c0_i32_0 = arith.constant 0 : i32
    return %arg0, %c0_i32 : i32, i32
  }
  func.func @transform_2(%arg0: i32) -> (i32, i32) {
    %c0_i32 = arith.constant 0 : i32
    %c0_i32_0 = arith.constant 0 : i32
    %c0_i32_1 = arith.constant 0 : i32
    return %c0_i32, %c0_i32_0 : i32, i32
  }
  func.func @transform_3(%arg0: i32) -> (i32, i32) {
    %c0_i32 = arith.constant 0 : i32
    %c0_i32_0 = arith.constant 0 : i32
    return %arg0, %c0_i32 : i32, i32
  }
}

</mosaic_0001>

<bundles_post_ra>
// kernel: tpu_custom_call.1
= control target key start
LH: loop header
LB: loop body
LE: loop exit
PB: predicated region body
PF: predicated region fallthrough
CT: control target
= control target key end

     0   :  { %vm18_vm0 = vcmask 130048   ;;  %s177_s0 = inlined_call_operand.vmem [shape: f32[8,16], index: 0, kind: input, shape index: {}]   ;;  %s178_s1 = inlined_call_operand.vmem [shape: s32[8,1], index: 1, kind: input, shape index: {}]   ;;  %s179_s2 = inlined_call_operand.vmem [shape: f32[1,16], index: 2, kind: input, shape index: {}]   ;;  %s180_s3 = inlined_call_operand.hbm [shape: f32[8,128], index: 3, kind: output, shape index: {}]  }
   0x1   :  { %v15_v0 = vld [vmem:[%s177_s0] sm:$0xff] }
   0x2   :  { %8 = vsyncpa [#allocation3], 0  ;;  %v19_v1 = vsel %vm18_vm0, %v15_v0, -inf  ;;  %v16_v2 = vld [vmem:[%s178_s1] sm:$0xff]  ;;  %v129_v3 = vmov 0   ;;  %v30_v9 = vlaneseq  ;;  %v130_v13 = vmov 0.0  }
   0x3   :  { %20 = vmax.xlane.f32.xlu0 %v19_v1  ;;  %97 = vset.pattern.permute.xlu1 %v129_v3  ;;  %v93_v12 = vld [vmem:[%s179_s2] ss:$0 sm:$0xff]  ;;  %s131_s1 = smov [#allocation2]  }
   0x4   :  { %98 = vset.pattern.permute.xlu0 %v129_v3  ;;  %33 = vperm.xlu1 %97, %v16_v2   ;;  %v31_v11 = vand.u32 127, %v30_v9  ;;  %s84_s2 = sshll.u32 %s131_s1, 4  ;;  %s85_s2 = int_to_ptr.vmem [resolvable:$true] %s84_s2 }
   0x5   :  { %s105_s17 = scalar_lea.vmem %s85_s2, 128  ;;  %p110_p1 = scmp.lt.s32.totalorder %s85_s2, %s85_s2 }
   0x6   :  { %p106_p0 = scmp.ne.s32.totalorder %s85_s2, %s105_s17  ;;  %p111_p2 = scmp.lt.s32.totalorder %s105_s17, %s105_s17 }
   0x8   :  { %p112_p3 = por %p111_p2, %p110_p1 }
   0xa   :  { %p113_p4 = pnand %p112_p3, %p106_p0 }
  0x83   :  { %v34_v10 = vpop.permute.xlu1 %33 }
  0x84   :  { %vm35_vm1 = vcmp.eq.s32.totalorder %v31_v11, %v34_v10 }
  0x85   :  { %v92_v14 = vsel %vm35_vm1, 1.0, %v130_v13 }
  0x86   :  { %v48_v15 = vmul.f32 %v93_v12, %v92_v14 }
  0x88   :  { %v49_v16 = vsel %vm18_vm0, %v48_v15, 0.0 }
  0x90   :  { %v21_v4 = vpop.xlane.xlu0 %20 }
  0x91   :  { %v22_v5 = vsub.f32 %v15_v0, %v21_v4 }
  0x93   :  { %v23_v6 = vmul.f32 1.442695, %v22_v5 }
  0x95   :  { %99 = vpow2.f32 %v23_v6 }
  0x9f   :  { %v100_v7 = vpop.eup %99 }
  0xa0   :  { %v25_v8 = vsel %vm18_vm0, %v100_v7, 0.0 }
  0xa1   :  { %26 = vadd.xlane.f32.xlu0 %v25_v8 }
  0xa5   :  { %50 = vadd.xlane.f32.xlu0 %v49_v16 }
 0x12e   :  { %v27_v17 = vpop.xlane.xlu0 %26 }
 0x12f   :  { %101 = vrcp.f32 %v27_v17 }
 0x132   :  { %v51_v27 = vpop.xlane.xlu0 %50 }
 0x133   :  { %v57_v29 = vsub.f32 0.0, %v51_v27 }
 0x139   :  { %v102_v18 = vpop.eup %101 }
 0x13a   :  { %v29_v19 = vmul.f32 %v102_v18, %v100_v7 }
 0x13c   :  { %v38_v20 = vmul.f32 %v92_v14, %v29_v19 }
 0x13e   :  { %v39_v21 = vsel %vm18_vm0, %v38_v20, 0.0 }
 0x13f   :  { %40 = vadd.xlane.f32.xlu1 %v39_v21 }
 0x1cc   :  { %v41_v22 = vpop.xlane.xlu1 %40 }
 0x1cd   :  { %v52_v23 = vmax.f32 %v41_v22, 0.0001 }
 0x1cf   :  { %v53_v24 = vmin.f32 %v52_v23, 1.0 }
 0x1d1   :  { %v54_v25 = vadd.f32 1e-08, %v53_v24  ;;  %v58_v26 = vsub.f32 1.0, %v53_v24 }
 0x1d3   :  { %103 = vlog2.f32 %v54_v25  ;;  %v59_v28 = vmul.f32 %v58_v26, %v58_v26 }
 0x1d5   :  { %v60_v32 = vmul.f32 %v59_v28, %v57_v29 }
 0x1dd   :  { %v104_v30 = vpop.eup %103 }
 0x1de   :  { %v56_v31 = vmul.f32 0.6931472, %v104_v30 }
 0x1e0   :  { %v61_v33 = vmul.f32 %v60_v32, %v56_v31 }
 0x1e2   :  { %v71_v34 = vrot.slane %v61_v33, 4 }
 0x1e4   :  { %v72_v35 = vadd.f32 %v71_v34, %v61_v33 }
 0x1e6   :  { %v73_v36 = vrot.slane %v72_v35, 2 }
 0x1e8   :  { %v74_v37 = vadd.f32 %v73_v36, %v72_v35 }
 0x1ea   :  { %v75_v38 = vrot.slane %v74_v37, 1 }
 0x1ec   :  { %v76_v39 = vadd.f32 %v75_v38, %v74_v37 }
 0x1ee   :  { %77 = vst [vmem:[#allocation2] sm:$0xff] %v76_v39 }
 0x1ef   :  { %116 = shalt.err (!%p113_p4)
}
 0x1f0   :  { %s117_s20 = scalar_lea.hbm %s180_s3, 128 }
 0x1f1   :  { %p118_p5 = scmp.ne.s32.totalorder %s180_s3, %s117_s20  ;;  %p121_p6 = scmp.lt.u32.totalorder %s117_s20, %s180_s3 }
 0x1f3   :  { %p123_p7 = pnand %p121_p6, %p118_p5 }
 0x1f5   :  { %126 = shalt.err (!%p123_p7)
}
 0x1f6   :  { %87 = dma.vmem_to_hbm [thread:$0]  %s85_s2, 128, %s180_s3, [#allocation3]  }
 0x1f7   :  { %127 = dma.done.wait [#allocation3], 128  }
 0x1f8   :  { %128 = vsyncadd [#allocation3], 4294967168 }
 0x1f9   :  { %91 = vsyncpa [#allocation3], 1 }

</bundles_post_ra>
